<compile_context>
chip_gen: v7x
topology: tpu7x:2x2x1
jax: 0.10.0
libtpu: 0.0.40
codegen_flags: <defaults>
</compile_context>

<pallas_src>
import jax
import jax.numpy as jnp
import numpy as np
from jax.experimental import pallas as pl
from jax.experimental.pallas import tpu as pltpu


# ----------------------------- Pallas kernel --------------------------------

def rope_kernel(x_ref, cos_ref, sin_ref, o_ref):
    """out[i] = x[i]*cos[i] + partner[i]*sin_signed[i] (interleaved even/odd pairs).

    partner[i] = x[i+1] on even lanes, x[i-1] on odd lanes: two non-negative XLU rolls
    plus one parity select.  Roll wraparound lanes only appear on the discarded parity
    (row width is even), so they never contribute.
    """
    cols = x_ref.shape[-1]
    x = x_ref[...].astype(jnp.float32)
    cos = cos_ref[...]                                 # f32: cos(theta) on both lanes of its pair
    sin_s = sin_ref[...]                               # f32: -sin on even lanes, +sin on odd lanes

    x_next = pltpu.roll(x, shift=cols - 1, axis=1)     # x[(i+1) mod cols]
    x_prev = pltpu.roll(x, shift=1, axis=1)            # x[(i-1) mod cols]
    # Cheap full-shape lane iota (VPU iota per vreg, no div/mod); parity via bit-and.
    lane = jax.lax.broadcasted_iota(jnp.int32, x.shape, 1)
    partner = jnp.where((lane & 1) == 0, x_next, x_prev)

    o_ref[...] = (x * cos + partner * sin_s).astype(o_ref.dtype)


# ------------------------------ Wrapper --------------------------------------

_COLS = 128                     # full-vreg lane width -> unmasked stores
_ROW_BLOCK_TARGET = 512         # ~85% of HBM roofline at 512 rows; half the VMEM
                                # temporaries of 1024 (matters on v7x: 64 MiB per TC)


def _choose_block_rows(n_rows: int, itemsize: int, target: int = _ROW_BLOCK_TARGET) -> int:
    """Rows per block: sublane-aligned for the dtype (8/16/32 rows for 4/2/1-byte) and
    never a giant un-pipelined fallback — the caller pads n_rows up if needed."""
    sub = max(8, 32 // max(1, itemsize))
    if n_rows <= target:
        return n_rows                      # single block; block dims == array dims is legal
    for cand in range(target, sub - 1, -sub):
        if n_rows % cand == 0:
            return cand
    return target                          # no aligned divisor: pad n_rows to a multiple


def rope_forward(x, token_positions, theta, d_k, max_seq_len):
    """RoPE forward.  x: (B, S, d_k), token_positions: (B, S) integer positions."""
    B, S, D = x.shape
    assert D == d_k, "last dim of x must be d_k"
    assert D % 2 == 0, "d_k must be even (interleaved pair rotation)"
    assert _COLS % 2 == 0, "roll-wraparound safety requires an even lane count"

    # --- per-token cos / sign-baked sin, gathered by XLA from the compact tables -------
    # Compact tables are exactly the torch module buffers: (max_seq_len, d_k//2) f32.
    # NOTE: like jnp.take, fancy indexing clamps out-of-range positions to the last row.
    position = jnp.arange(max_seq_len, dtype=jnp.float32)
    dim = jnp.arange(0, d_k, 2, dtype=jnp.float32)
    angle = position[:, None] * (1.0 / (theta ** (dim / d_k)))     # (max_seq_len, d_k//2)
    cos_tab = jnp.cos(angle)
    sin_tab = jnp.sin(angle)

    tp = token_positions.astype(jnp.int32)
    cos_g = cos_tab[tp]                                            # (B, S, d_k//2)
    sin_g = sin_tab[tp]
    # Expand each frequency to its (even, odd) lane pair; bake the rotation sign into sin
    # so the kernel is one fused multiply-add per lane.
    cos_e = jnp.stack([cos_g, cos_g], axis=-1).reshape(B, S, D)    # lanes 2k, 2k+1 -> cos_k
    sin_e = jnp.stack([-sin_g, sin_g], axis=-1).reshape(B, S, D)   # lane 2k -> -sin_k, 2k+1 -> +sin_k

    # --- lane-dense packing: flatten to (R, 128) rows (free reshape, pairs stay intact) -
    L = B * S * D
    R = (L + _COLS - 1) // _COLS
    TM = _choose_block_rows(R, x.dtype.itemsize)
    R_pad = ((R + TM - 1) // TM) * TM
    L_pad = R_pad * _COLS

    def _rows(a):
        a = a.reshape(-1)
        if L_pad != L:
            a = jnp.pad(a, (0, L_pad - L))
        return a.reshape(R_pad, _COLS)

    x2 = _rows(x)
    cos2 = _rows(cos_e.astype(jnp.float32))
    sin2 = _rows(sin_e.astype(jnp.float32))

    grid = (R_pad // TM,)

    # --- explicit VMEM budget: 3 inputs + 1 output, double-buffered, plus margin.
    # No resident table, so the footprint is a few MiB on every generation
    # (v7x: 64 MiB/TC with megacore sharding; v5e/v6e: 32 MiB default scoped limit).
    block = TM * _COLS
    stream_bytes = 2 * block * (2 * x.dtype.itemsize + 2 * 4)      # x/out + cos/sin, double-buffered
    vmem_limit = int(min(64 << 20, max(32 << 20, 2 * stream_bytes + (8 << 20))))

    spec = pl.BlockSpec((TM, _COLS), lambda i: (i, 0))
    out2 = pl.pallas_call(
        rope_kernel,
        out_shape=jax.ShapeDtypeStruct((R_pad, _COLS), x.dtype),
        grid=grid,
        in_specs=[spec, spec, spec],
        out_specs=spec,
        compiler_params=pltpu.CompilerParams(
            dimension_semantics=("parallel",),       # independent row blocks (megacore on v7x)
            vmem_limit_bytes=vmem_limit,
        ),
    )(x2, cos2, sin2)

    out = out2.reshape(-1)
    if L_pad != L:
        out = out[:L]
    return out.reshape(B, S, D)


# --------------------------- Pure-JAX reference -------------------------------

def rope_ref(x, token_positions, theta, d_k, max_seq_len):
    position = jnp.arange(max_seq_len, dtype=jnp.float32)
    dim = jnp.arange(0, d_k, 2, dtype=jnp.float32)
    angle = position[:, None] * (1.0 / theta ** (dim / d_k))
    sin = jnp.sin(angle)[token_positions]
    cos = jnp.cos(angle)[token_positions]
    x_even = x[..., 0::2]
    x_odd = x[..., 1::2]
    x_rot_even = x_even * cos - x_odd * sin
    x_rot_odd = x_even * sin + x_odd * cos
    return jnp.stack((x_rot_even, x_rot_odd), axis=-1).reshape(x.shape)


# ------------------------------- Main -----------------------------------------

if __name__ == "__main__":
    theta = 10000.0
    d_k = 32
    max_seq_len = 64
    B, S = 2, 8

    key = jax.random.PRNGKey(0)
    kx, kp = jax.random.split(key)
    x = jax.random.normal(kx, (B, S, d_k), dtype=jnp.float32)
    token_positions = jax.random.randint(kp, (B, S), 0, max_seq_len, dtype=jnp.int32)

    out = rope_forward(x, token_positions, theta, d_k, max_seq_len)
    out = jax.block_until_ready(out)

    ref = rope_ref(x, token_positions, theta, d_k, max_seq_len)
    np.testing.assert_allclose(np.asarray(out), np.asarray(ref), atol=1e-5, rtol=1e-5)

    print("KERNEL_OK")
</pallas_src>

<mosaic_0001>
module attributes {stable_mosaic.version = 11 : i64} {
  func.func @rope_kernel(%arg0: i32, %arg1: memref<4x128xf32, #tpu.memory_space<vmem>>, %arg2: memref<4x128xf32, #tpu.memory_space<vmem>>, %arg3: memref<4x128xf32, #tpu.memory_space<vmem>>, %arg4: memref<4x128xf32, #tpu.memory_space<vmem>>) attributes {dimension_semantics = [#tpu.dimension_semantics<parallel>], iteration_bounds = array<i64: 1>, scalar_prefetch = 0 : i64, scratch_operands = 0 : i64, tpu.core_type = #tpu.core_type<tc>, window_params = [{transform_indices = @transform_0, window_bounds = array<i64: 4, 128>}, {transform_indices = @transform_1, window_bounds = array<i64: 4, 128>}, {transform_indices = @transform_2, window_bounds = array<i64: 4, 128>}, {transform_indices = @transform_3, window_bounds = array<i64: 4, 128>}]} {
    %c0 = arith.constant 0 : index
    %c0_0 = arith.constant 0 : index
    %0 = vector.load %arg1[%c0, %c0_0] : memref<4x128xf32, #tpu.memory_space<vmem>>, vector<4x128xf32>
    %c0_1 = arith.constant 0 : index
    %c0_2 = arith.constant 0 : index
    %1 = vector.load %arg2[%c0_1, %c0_2] : memref<4x128xf32, #tpu.memory_space<vmem>>, vector<4x128xf32>
    %c0_3 = arith.constant 0 : index
    %c0_4 = arith.constant 0 : index
    %2 = vector.load %arg3[%c0_3, %c0_4] : memref<4x128xf32, #tpu.memory_space<vmem>>, vector<4x128xf32>
    %c127_i32 = arith.constant 127 : i32
    %3 = tpu.dynamic_rotate %0 by %c127_i32 dim 1 : vector<4x128xf32>, i32 -> vector<4x128xf32>
    %c1_i32 = arith.constant 1 : i32
    %4 = tpu.dynamic_rotate %0 by %c1_i32 dim 1 : vector<4x128xf32>, i32 -> vector<4x128xf32>
    %5 = tpu.iota {dimensions = array<i32: 1>} : vector<4x128xi32>
    %c1_i32_5 = arith.constant 1 : i32
    %6 = vector.broadcast %c1_i32_5 : i32 to vector<4x128xi32>
    %7 = arith.andi %5, %6 : vector<4x128xi32>
    %c0_i32 = arith.constant 0 : i32
    %8 = vector.broadcast %c0_i32 : i32 to vector<4x128xi32>
    %9 = arith.cmpi eq, %7, %8 : vector<4x128xi32>
    %10 = arith.select %9, %3, %4 : vector<4x128xi1>, vector<4x128xf32>
    %11 = arith.mulf %0, %1 : vector<4x128xf32>
    %12 = arith.mulf %10, %2 : vector<4x128xf32>
    %13 = arith.addf %11, %12 : vector<4x128xf32>
    %c0_6 = arith.constant 0 : index
    %c0_7 = arith.constant 0 : index
    %14 = vector.load %arg4[%c0_6, %c0_7] : memref<4x128xf32, #tpu.memory_space<vmem>>, vector<4x128xf32>
    tpu.vector_store %arg4[%c0_6, %c0_7], %13 {strides = array<i32>} : memref<4x128xf32, #tpu.memory_space<vmem>>, vector<4x128xf32>,
    return
  }
  func.func @transform_0(%arg0: i32) -> (i32, i32) {
    %c0_i32 = arith.constant 0 : i32
    %c0_i32_0 = arith.constant 0 : i32
    return %arg0, %c0_i32 : i32, i32
  }
  func.func @transform_1(%arg0: i32) -> (i32, i32) {
    %c0_i32 = arith.constant 0 : i32
    %c0_i32_0 = arith.constant 0 : i32
    return %arg0, %c0_i32 : i32, i32
  }
  func.func @transform_2(%arg0: i32) -> (i32, i32) {
    %c0_i32 = arith.constant 0 : i32
    %c0_i32_0 = arith.constant 0 : i32
    return %arg0, %c0_i32 : i32, i32
  }
  func.func @transform_3(%arg0: i32) -> (i32, i32) {
    %c0_i32 = arith.constant 0 : i32
    %c0_i32_0 = arith.constant 0 : i32
    return %arg0, %c0_i32 : i32, i32
  }
}

</mosaic_0001>

<bundles_post_ra>
// kernel: tpu_custom_call.1
= control target key start
LH: loop header
LB: loop body
LE: loop exit
PB: predicated region body
PF: predicated region fallthrough
CT: control target
= control target key end

     0   :  { %8 = vsyncpa [#allocation3], 0  ;;  %s212_s0 = inlined_call_operand.hbm [shape: f32[4,128], index: 0, kind: input, shape index: {}]   ;;  %s213_s1 = inlined_call_operand.hbm [shape: f32[4,128], index: 1, kind: input, shape index: {}]   ;;  %s214_s2 = inlined_call_operand.vmem [shape: f32[4,128], index: 2, kind: input, shape index: {}]   ;;  %s215_s3 = inlined_call_operand.hbm [shape: f32[4,128], index: 3, kind: output, shape index: {}]  }
   0x1   :  { %9 = vsyncpa [#allocation6], 0 }
   0x2   :  { %10 = vsyncpa [#allocation4], 0  ;;  %s148_s12 = smov [#allocation2]   ;;  %s149_s14 = smov [#allocation5]  }
   0x3   :  { %s17_s13 = sshll.u32 %s148_s12, 4  ;;  %s27_s15 = sshll.u32 %s149_s14, 4  ;;  %s18_s13 = int_to_ptr.vmem [resolvable:$true] %s17_s13  ;;  %s28_s15 = int_to_ptr.vmem [resolvable:$true] %s27_s15 }
   0x4   :  { %s76_s18 = scalar_lea.hbm %s212_s0, 64 }
   0x5   :  { %p77_p0 = scmp.ne.s32.totalorder %s212_s0, %s76_s18  ;;  %p80_p1 = scmp.lt.u32.totalorder %s76_s18, %s212_s0 }
   0x7   :  { %p82_p2 = pnand %p80_p1, %p77_p0 }
   0x9   :  { %85 = shalt.err (!%p82_p2)
}
   0xa   :  { %s86_s23 = scalar_lea.vmem %s18_s13, 64  ;;  %p91_p4 = scmp.lt.s32.totalorder %s18_s13, %s18_s13 }
   0xb   :  { %p87_p3 = scmp.ne.s32.totalorder %s18_s13, %s86_s23  ;;  %p92_p5 = scmp.lt.s32.totalorder %s86_s23, %s86_s23 }
   0xd   :  { %p93_p6 = por %p92_p5, %p91_p4 }
   0xf   :  { %p94_p7 = pnand %p93_p6, %p87_p3 }
  0x11   :  { %97 = shalt.err (!%p94_p7)
}
  0x12   :  { %20 = dma.hbm_to_vmem [thread:$0]  %s212_s0, 64, %s18_s13, [#allocation3]  }
  0x13   :  { %s98_s28 = scalar_lea.hbm %s213_s1, 64 }
  0x14   :  { %p99_p8 = scmp.ne.s32.totalorder %s213_s1, %s98_s28  ;;  %p102_p9 = scmp.lt.u32.totalorder %s98_s28, %s213_s1 }
  0x16   :  { %p104_p10 = pnand %p102_p9, %p99_p8 }
  0x18   :  { %107 = shalt.err (!%p104_p10)
}
  0x19   :  { %s108_s6 = scalar_lea.vmem %s28_s15, 64  ;;  %p113_p12 = scmp.lt.s32.totalorder %s28_s15, %s28_s15 }
  0x1a   :  { %p109_p11 = scmp.ne.s32.totalorder %s28_s15, %s108_s6  ;;  %p114_p13 = scmp.lt.s32.totalorder %s108_s6, %s108_s6 }
  0x1c   :  { %p115_p0 = por %p114_p13, %p113_p12 }
  0x1e   :  { %p116_p1 = pnand %p115_p0, %p109_p11 }
  0x20   :  { %119 = shalt.err (!%p116_p1)
}
  0x21   :  { %30 = dma.hbm_to_vmem [thread:$0]  %s213_s1, 64, %s28_s15, [#allocation6]  }
  0x22   :  { %142 = dma.done.wait [#allocation3], 64  }
  0x23   :  { %143 = vsyncadd [#allocation3], 4294967232 }
  0x24   :  { %144 = dma.done.wait [#allocation6], 64  }
  0x25   :  { %145 = vsyncadd [#allocation6], 4294967232  ;;  %v39_v0 = vld [vmem:[#allocation2] sm:$0xf]  ;;  %s150_s8 = smov 127   ;;  %s151_s9 = smov 1   ;;  %v46_v1 = vlaneseq }
  0x26   :  { %42 = vrot.lane.b32.xlu0 %v39_v0, %s150_s8  ;;  %v40_v5 = vld [vmem:[#allocation5] sm:$0xf]  ;;  %v41_v6 = vld [vmem:[%s214_s2] sm:$0xf]  ;;  %s152_s1 = smov [#allocation7]  }
  0x27   :  { %v47_v2 = vand.u32 127, %v46_v1  ;;  %v51_v7 = vmul.f32 %v40_v5, %v39_v0  ;;  %s61_s12 = sshll.u32 %s152_s1, 4  ;;  %s62_s12 = int_to_ptr.vmem [resolvable:$true] %s61_s12 }
  0x28   :  { %s120_s13 = scalar_lea.vmem %s62_s12, 64  ;;  %p125_p3 = scmp.lt.s32.totalorder %s62_s12, %s62_s12 }
  0x29   :  { %v48_v3 = vand.u32 1, %v47_v2  ;;  %p121_p2 = scmp.ne.s32.totalorder %s62_s12, %s120_s13  ;;  %p126_p4 = scmp.lt.s32.totalorder %s120_s13, %s120_s13 }
  0x2a   :  { %44 = vrot.lane.b32.xlu0 %v39_v0, %s151_s9 }
  0x2b   :  { %vm49_vm0 = vcmp.eq.s32.totalorder %v48_v3, 0  ;;  %p127_p5 = por %p126_p4, %p125_p3 }
  0x2d   :  { %p128_p6 = pnand %p127_p5, %p121_p2 }
  0x98   :  { %v43_v4 = vpop.permute.xlu0 %42 }
  0x9c   :  { %v45_v8 = vpop.permute.xlu0 %44 }
  0x9d   :  { %v50_v9 = vsel %vm49_vm0, %v43_v4, %v45_v8 }
  0x9e   :  { %v52_v10 = vmul.f32 %v50_v9, %v41_v6 }
  0xa0   :  { %v53_v11 = vadd.f32 %v52_v10, %v51_v7 }
  0xa2   :  { %54 = vst [vmem:[#allocation7] sm:$0xf] %v53_v11 }
  0xa3   :  { %131 = shalt.err (!%p128_p6)
}
  0xa4   :  { %s132_s2 = scalar_lea.hbm %s215_s3, 64 }
  0xa5   :  { %p133_p7 = scmp.ne.s32.totalorder %s215_s3, %s132_s2  ;;  %p136_p8 = scmp.lt.u32.totalorder %s132_s2, %s215_s3 }
  0xa7   :  { %p138_p9 = pnand %p136_p8, %p133_p7 }
  0xa9   :  { %141 = shalt.err (!%p138_p9)
}
  0xaa   :  { %64 = dma.vmem_to_hbm [thread:$0]  %s62_s12, 64, %s215_s3, [#allocation4]  }
  0xab   :  { %146 = dma.done.wait [#allocation4], 64  }
  0xac   :  { %147 = vsyncadd [#allocation4], 4294967232 }
  0xad   :  { %68 = vsyncpa [#allocation3], 1 }
  0xae   :  { %69 = vsyncpa [#allocation6], 1 }
  0xaf   :  { %70 = vsyncpa [#allocation4], 1 }

</bundles_post_ra>
